<compile_context>
chip_gen: v7x
topology: tpu7x:2x2x1
jax: 0.10.0
libtpu: 0.0.40
codegen_flags: <defaults>
</compile_context>

<pallas_src>
import jax
import jax.numpy as jnp
import numpy as np
from jax.experimental import pallas as pl
from jax.experimental.pallas import tpu as pltpu


def _resblock_kernel(x_ref, m1_ref, b1_ref, m2_ref, b2_ref, o_ref, xs_ref):
    # x_ref : (1, H, W*C)        input image, lane-dense (w, c)-flattened
    # m1_ref: (3*W*C, W*C)       stacked lowered 3x3 conv weights (ky-major)
    # b1_ref: (1, W*C)           conv1 bias tiled over w
    # m2_ref: (W*C, W*C)         block-diagonal 1x1 conv weights
    # b2_ref: (1, W*C)           conv2 bias tiled over w
    # o_ref : (1, H, W*C)
    # xs_ref: (H, 3*W*C)         VMEM scratch: im2row-stacked relu(x)
    H = x_ref.shape[1]
    WC = x_ref.shape[2]

    x = x_ref[0]                                           # (H, W*C)
    xr = jnp.maximum(x, 0.0)                               # first ReLU (reused)

    # Build the stacked LHS: column block ky holds input rows shifted by
    # (ky - 1), with zero rows at the top/bottom image border (pad=1).
    xs_ref[:, WC:2 * WC] = xr                              # ky = 1 (center)
    xs_ref[0:1, 0:WC] = jnp.zeros((1, WC), jnp.float32)    # ky = 0, row -1 pad
    xs_ref[1:H, 0:WC] = xr[0:H - 1, :]
    xs_ref[0:H - 1, 2 * WC:3 * WC] = xr[1:H, :]            # ky = 2
    xs_ref[H - 1:H, 2 * WC:3 * WC] = jnp.zeros((1, WC), jnp.float32)

    # 3x3 "same" conv: one MXU matmul, K = 3*W*C, fp32 accumulation.
    acc = jnp.dot(xs_ref[...], m1_ref[...],
                  preferred_element_type=jnp.float32)      # (H, W*C)

    h = jnp.maximum(acc + b1_ref[0], 0.0)                  # bias + second ReLU

    # 1x1 conv as block-diagonal matmul; bias + residual add in the same
    # flattened lane-dense slab; single store.
    y = jnp.dot(h, m2_ref[...], preferred_element_type=jnp.float32) + b2_ref[0]
    o_ref[0] = x + y


def resblock_pallas(x_nchw, w1, b1, w2, b2):
    """x_nchw: (N,C,H,W) f32. w1: (3,3,Cin,Cout) HWIO, b1: (Cout,), w2: (Cout,Cout), b2: (Cout,)."""
    N, C, H, W = x_nchw.shape
    Cout = w1.shape[-1]
    assert C == Cout, "residual add requires in_channels == out_channels"
    WC = W * Cout

    # Layout glue: NCHW -> NHWC -> (N, H, W*C) lane-dense slab (single input).
    x_flat = jnp.transpose(x_nchw, (0, 2, 3, 1)).reshape(N, H, WC)

    # Lowered weights (built once per call; small for small W*C):
    #   m1_ky[(w+kx-1)*C + ci, w*C + co] = w1[ky, kx, ci, co]
    # with kx border clipping handled by the shifted identity; the three ky
    # matrices are stacked along the contraction dim -> one (3*W*C, W*C) matmul.
    m1 = jnp.concatenate([
        sum(jnp.kron(jnp.eye(W, k=1 - kx, dtype=w1.dtype), w1[ky, kx])
            for kx in range(3))
        for ky in range(3)
    ], axis=0)                                             # (3*W*C, W*C)
    m2 = jnp.kron(jnp.eye(W, dtype=w2.dtype), w2)          # (W*C, W*C)
    b1_flat = jnp.tile(b1, W).reshape(1, WC)
    b2_flat = jnp.tile(b2, W).reshape(1, WC)

    # Explicit VMEM budget from block footprint (double-buffered blocks + scratch).
    block_bytes = 4 * (H * WC            # x block
                       + 3 * WC * WC     # m1 (stacked)
                       + WC * WC         # m2
                       + 2 * WC          # biases
                       + H * WC)         # out block
    scratch_bytes = 4 * H * 3 * WC
    vmem_limit = int(min(100 * 1024 * 1024,
                         max(16 * 1024 * 1024, 4 * block_bytes + scratch_bytes)))

    out_flat = pl.pallas_call(
        _resblock_kernel,
        out_shape=jax.ShapeDtypeStruct((N, H, WC), jnp.float32),
        grid_spec=pltpu.PrefetchScalarGridSpec(
            num_scalar_prefetch=0,
            grid=(N,),
            in_specs=[
                pl.BlockSpec((1, H, WC), lambda n: (n, 0, 0)),
                pl.BlockSpec((3 * WC, WC), lambda n: (0, 0)),
                pl.BlockSpec((1, WC), lambda n: (0, 0)),
                pl.BlockSpec((WC, WC), lambda n: (0, 0)),
                pl.BlockSpec((1, WC), lambda n: (0, 0)),
            ],
            out_specs=pl.BlockSpec((1, H, WC), lambda n: (n, 0, 0)),
            scratch_shapes=[pltpu.VMEM((H, 3 * WC), jnp.float32)],
        ),
        compiler_params=pltpu.CompilerParams(
            dimension_semantics=("parallel",),
            vmem_limit_bytes=vmem_limit),
    )(x_flat, m1, b1_flat, m2, b2_flat)

    return jnp.transpose(out_flat.reshape(N, H, W, Cout), (0, 3, 1, 2))


def resblock_ref(x_nchw, w1, b1, w2, b2):
    """Pure-JAX reference (matches PyTorch ResBlock.forward semantics)."""
    x = jnp.transpose(x_nchw, (0, 2, 3, 1))
    h = jax.nn.relu(x)
    h = jax.lax.conv_general_dilated(
        h, w1, window_strides=(1, 1), padding="SAME",
        dimension_numbers=("NHWC", "HWIO", "NHWC")) + b1
    h = jax.nn.relu(h)
    C = w2.shape[0]
    h = jax.lax.conv_general_dilated(
        h, w2.reshape(1, 1, C, C), window_strides=(1, 1), padding="VALID",
        dimension_numbers=("NHWC", "HWIO", "NHWC")) + b2
    return jnp.transpose(x + h, (0, 3, 1, 2))


if __name__ == "__main__":
    N, C, H, W = 2, 4, 16, 16  # in_channels == out_channels == 4

    key = jax.random.PRNGKey(0)
    kx, kw1, kb1, kw2, kb2 = jax.random.split(key, 5)

    x = jax.random.normal(kx, (N, C, H, W), dtype=jnp.float32)

    # Deterministic parameter init (kaiming-ish scaling; synthetic, no checkpoint).
    w1 = jax.random.normal(kw1, (3, 3, C, C), dtype=jnp.float32) * (1.0 / np.sqrt(9 * C))
    b1 = jax.random.normal(kb1, (C,), dtype=jnp.float32) * 0.01
    w2 = jax.random.normal(kw2, (C, C), dtype=jnp.float32) * (1.0 / np.sqrt(C))
    b2 = jax.random.normal(kb2, (C,), dtype=jnp.float32) * 0.01

    out = resblock_pallas(x, w1, b1, w2, b2)
    out = jax.block_until_ready(out)

    ref = jax.block_until_ready(resblock_ref(x, w1, b1, w2, b2))
    assert out.shape == (N, C, H, W)
    np.testing.assert_allclose(np.asarray(out), np.asarray(ref), rtol=1e-5, atol=1e-5)

    print("KERNEL_OK")
</pallas_src>

<mosaic_0001>
module attributes {stable_mosaic.version = 11 : i64} {
  func.func @_resblock_kernel(%arg0: i32, %arg1: memref<1x16x64xf32, #tpu.memory_space<vmem>>, %arg2: memref<192x64xf32, #tpu.memory_space<vmem>>, %arg3: memref<1x64xf32, #tpu.memory_space<vmem>>, %arg4: memref<64x64xf32, #tpu.memory_space<vmem>>, %arg5: memref<1x64xf32, #tpu.memory_space<vmem>>, %arg6: memref<1x16x64xf32, #tpu.memory_space<vmem>>, %arg7: memref<16x192xf32, #tpu.memory_space<vmem>>) attributes {dimension_semantics = [#tpu.dimension_semantics<parallel>], iteration_bounds = array<i64: 2>, scalar_prefetch = 0 : i64, scratch_operands = 1 : i64, tpu.core_type = #tpu.core_type<tc>, window_params = [{transform_indices = @transform_0, window_bounds = array<i64: 1, 16, 64>}, {pipeline_mode = #tpu.pipeline_mode<synchronous>, transform_indices = @transform_1, window_bounds = array<i64: 192, 64>}, {pipeline_mode = #tpu.pipeline_mode<synchronous>, transform_indices = @transform_2, window_bounds = array<i64: 1, 64>}, {pipeline_mode = #tpu.pipeline_mode<synchronous>, transform_indices = @transform_3, window_bounds = array<i64: 64, 64>}, {pipeline_mode = #tpu.pipeline_mode<synchronous>, transform_indices = @transform_4, window_bounds = array<i64: 1, 64>}, {transform_indices = @transform_5, window_bounds = array<i64: 1, 16, 64>}]} {
    %c0 = arith.constant 0 : index
    %c0_0 = arith.constant 0 : index
    %c0_1 = arith.constant 0 : index
    %0 = vector.load %arg1[%c0, %c0_0, %c0_1] : memref<1x16x64xf32, #tpu.memory_space<vmem>>, vector<1x16x64xf32>
    %1 = vector.shape_cast %0 : vector<1x16x64xf32> to vector<16x64xf32>
    %cst = arith.constant 0.000000e+00 : f32
    %2 = vector.broadcast %cst : f32 to vector<16x64xf32>
    %3 = arith.maximumf %1, %2 : vector<16x64xf32>
    %c0_2 = arith.constant 0 : index
    %c64 = arith.constant 64 : index
    %4 = vector.load %arg7[%c0_2, %c64] : memref<16x192xf32, #tpu.memory_space<vmem>>, vector<16x64xf32>
    tpu.vector_store %arg7[%c0_2, %c64], %3 {strides = array<i32>} : memref<16x192xf32, #tpu.memory_space<vmem>>, vector<16x64xf32>,
    %cst_3 = arith.constant 0.000000e+00 : f32
    %5 = vector.broadcast %cst_3 : f32 to vector<1x64xf32>
    %c0_4 = arith.constant 0 : index
    %c0_5 = arith.constant 0 : index
    %6 = vector.load %arg7[%c0_4, %c0_5] : memref<16x192xf32, #tpu.memory_space<vmem>>, vector<1x64xf32>
    tpu.vector_store %arg7[%c0_4, %c0_5], %5 {strides = array<i32>} : memref<16x192xf32, #tpu.memory_space<vmem>>, vector<1x64xf32>,
    %7 = vector.extract_strided_slice %3 {offsets = [0, 0], sizes = [15, 64], strides = [1, 1]} : vector<16x64xf32> to vector<15x64xf32>
    %c1 = arith.constant 1 : index
    %c0_6 = arith.constant 0 : index
    %8 = vector.load %arg7[%c1, %c0_6] : memref<16x192xf32, #tpu.memory_space<vmem>>, vector<15x64xf32>
    tpu.vector_store %arg7[%c1, %c0_6], %7 {strides = array<i32>} : memref<16x192xf32, #tpu.memory_space<vmem>>, vector<15x64xf32>,
    %9 = vector.extract_strided_slice %3 {offsets = [1, 0], sizes = [15, 64], strides = [1, 1]} : vector<16x64xf32> to vector<15x64xf32>
    %c0_7 = arith.constant 0 : index
    %c128 = arith.constant 128 : index
    %10 = vector.load %arg7[%c0_7, %c128] : memref<16x192xf32, #tpu.memory_space<vmem>>, vector<15x64xf32>
    tpu.vector_store %arg7[%c0_7, %c128], %9 {strides = array<i32>} : memref<16x192xf32, #tpu.memory_space<vmem>>, vector<15x64xf32>,
    %cst_8 = arith.constant 0.000000e+00 : f32
    %11 = vector.broadcast %cst_8 : f32 to vector<1x64xf32>
    %c15 = arith.constant 15 : index
    %c128_9 = arith.constant 128 : index
    %12 = vector.load %arg7[%c15, %c128_9] : memref<16x192xf32, #tpu.memory_space<vmem>>, vector<1x64xf32>
    tpu.vector_store %arg7[%c15, %c128_9], %11 {strides = array<i32>} : memref<16x192xf32, #tpu.memory_space<vmem>>, vector<1x64xf32>,
    %c0_10 = arith.constant 0 : index
    %c0_11 = arith.constant 0 : index
    %13 = vector.load %arg7[%c0_10, %c0_11] : memref<16x192xf32, #tpu.memory_space<vmem>>, vector<16x192xf32>
    %c0_12 = arith.constant 0 : index
    %c0_13 = arith.constant 0 : index
    %14 = vector.load %arg2[%c0_12, %c0_13] : memref<192x64xf32, #tpu.memory_space<vmem>>, vector<192x64xf32>
    %cst_14 = arith.constant dense<0.000000e+00> : vector<16x64xf32>
    %15 = tpu.matmul %13, %14, %cst_14 {dimension_numbers = #tpu.dot_dimension_numbers<[1], [0], [0], [1], [0, 0, 1, 1], [], []>} : vector<16x192xf32>, vector<192x64xf32>, vector<16x64xf32> -> vector<16x64xf32>
    %c0_15 = arith.constant 0 : index
    %c0_16 = arith.constant 0 : index
    %16 = vector.load %arg3[%c0_15, %c0_16] : memref<1x64xf32, #tpu.memory_space<vmem>>, vector<1x64xf32>
    %17 = vector.shape_cast %16 : vector<1x64xf32> to vector<64xf32>
    %18 = vector.shape_cast %17 : vector<64xf32> to vector<1x64xf32>
    %19 = vector.broadcast %18 : vector<1x64xf32> to vector<16x64xf32>
    %20 = arith.addf %15, %19 : vector<16x64xf32>
    %cst_17 = arith.constant 0.000000e+00 : f32
    %21 = vector.broadcast %cst_17 : f32 to vector<16x64xf32>
    %22 = arith.maximumf %20, %21 : vector<16x64xf32>
    %c0_18 = arith.constant 0 : index
    %c0_19 = arith.constant 0 : index
    %23 = vector.load %arg4[%c0_18, %c0_19] : memref<64x64xf32, #tpu.memory_space<vmem>>, vector<64x64xf32>
    %cst_20 = arith.constant dense<0.000000e+00> : vector<16x64xf32>
    %24 = tpu.matmul %22, %23, %cst_20 {dimension_numbers = #tpu.dot_dimension_numbers<[1], [0], [0], [1], [0, 0, 1, 1], [], []>} : vector<16x64xf32>, vector<64x64xf32>, vector<16x64xf32> -> vector<16x64xf32>
    %c0_21 = arith.constant 0 : index
    %c0_22 = arith.constant 0 : index
    %25 = vector.load %arg5[%c0_21, %c0_22] : memref<1x64xf32, #tpu.memory_space<vmem>>, vector<1x64xf32>
    %26 = vector.shape_cast %25 : vector<1x64xf32> to vector<64xf32>
    %27 = vector.shape_cast %26 : vector<64xf32> to vector<1x64xf32>
    %28 = vector.broadcast %27 : vector<1x64xf32> to vector<16x64xf32>
    %29 = arith.addf %24, %28 : vector<16x64xf32>
    %30 = arith.addf %1, %29 : vector<16x64xf32>
    %c0_23 = arith.constant 0 : index
    %c0_24 = arith.constant 0 : index
    %c0_25 = arith.constant 0 : index
    %31 = vector.load %arg6[%c0_23, %c0_24, %c0_25] : memref<1x16x64xf32, #tpu.memory_space<vmem>>, vector<1x16x64xf32>
    %32 = vector.shape_cast %31 : vector<1x16x64xf32> to vector<16x64xf32>
    %33 = vector.shape_cast %30 : vector<16x64xf32> to vector<1x16x64xf32>
    tpu.vector_store %arg6[%c0_23, %c0_24, %c0_25], %33 {strides = array<i32>} : memref<1x16x64xf32, #tpu.memory_space<vmem>>, vector<1x16x64xf32>,
    return
  }
  func.func @transform_0(%arg0: i32) -> (i32, i32, i32) {
    %c0_i32 = arith.constant 0 : i32
    %c0_i32_0 = arith.constant 0 : i32
    %c0_i32_1 = arith.constant 0 : i32
    return %arg0, %c0_i32, %c0_i32_0 : i32, i32, i32
  }
  func.func @transform_1(%arg0: i32) -> (i32, i32) {
    %c0_i32 = arith.constant 0 : i32
    %c0_i32_0 = arith.constant 0 : i32
    %c0_i32_1 = arith.constant 0 : i32
    return %c0_i32, %c0_i32_0 : i32, i32
  }
  func.func @transform_2(%arg0: i32) -> (i32, i32) {
    %c0_i32 = arith.constant 0 : i32
    %c0_i32_0 = arith.constant 0 : i32
    %c0_i32_1 = arith.constant 0 : i32
    return %c0_i32, %c0_i32_0 : i32, i32
  }
  func.func @transform_3(%arg0: i32) -> (i32, i32) {
    %c0_i32 = arith.constant 0 : i32
    %c0_i32_0 = arith.constant 0 : i32
    %c0_i32_1 = arith.constant 0 : i32
    return %c0_i32, %c0_i32_0 : i32, i32
  }
  func.func @transform_4(%arg0: i32) -> (i32, i32) {
    %c0_i32 = arith.constant 0 : i32
    %c0_i32_0 = arith.constant 0 : i32
    %c0_i32_1 = arith.constant 0 : i32
    return %c0_i32, %c0_i32_0 : i32, i32
  }
  func.func @transform_5(%arg0: i32) -> (i32, i32, i32) {
    %c0_i32 = arith.constant 0 : i32
    %c0_i32_0 = arith.constant 0 : i32
    %c0_i32_1 = arith.constant 0 : i32
    return %arg0, %c0_i32, %c0_i32_0 : i32, i32, i32
  }
}

</mosaic_0001>

<bundles_post_ra>
// kernel: tpu_custom_call.1
= control target key start
LH: loop header
LB: loop body
LE: loop exit
PB: predicated region body
PF: predicated region fallthrough
CT: control target
= control target key end

     0   :  { %10 = vsyncpa [#allocation4], 0  ;;  %s1048_s0 = inlined_call_operand.vmem [shape: f32[2,16,64], index: 0, kind: input, shape index: {}]   ;;  %s1049_s1 = inlined_call_operand.vmem [shape: f32[192,64], index: 1, kind: input, shape index: {}]   ;;  %s1050_s2 = inlined_call_operand.vmem [shape: f32[1,64], index: 2, kind: input, shape index: {}]   ;;  %s1051_s3 = inlined_call_operand.vmem [shape: f32[64,64], index: 3, kind: input, shape index: {}]   ;;  %s1052_s4 = inlined_call_operand.vmem [shape: f32[1,64], index: 4, kind: input, shape index: {}]   ;;  %s1053_s5 = inlined_call_operand.hbm [shape: f32[2,16,64], index: 5, kind: output, shape index: {}]  }
   0x1   :  { %12 = vsyncpa [#allocation4 + $0x1], 0  ;;  %s799_s18 = smov 0   ;;  %s801_s19 = smov 0  }
   0x2   :  { %s803_s20 = smov 0   ;;  %s805_s21 = smov 0  }
   0x3 LB: > { %s820_s22 = sadd.s32 4294967295, %s761_s21   ;;  %s554_s23 = sadd.s32 4294967294, %s761_s21   ;;  %s761_s21 = sphi %s805_s21, %s1059_s21   ;;  %s757_s20 = sphi %s803_s20, %s1058_s20   ;;  %s753_s19 = sphi %s801_s19, %s1057_s19   ;;  %s749_s18 = sphi %s799_s18, %s1056_s18  }
   0x4   : > { %s824_s24 = sadd.s32 1, %s761_s21   ;;  %s135_s25 = sadd.s32 1, %s757_s20 }
   0x5   : > { %s132_s26 = ssub.s32 %s761_s21, %s824_s24  ;;  %p145_p0 = scmp.ne.s32.totalorder %s757_s20, %s753_s19 }
   0x6   : > { %p133_p1 = scmp.eq.s32.totalorder %s132_s26, 0  ;;  %p146_p2 = scmp.eq.s32.totalorder %s820_s22, 1 }
   0x7   : > { %p151_p3 = scmp.ne.s32.totalorder %s753_s19, %s749_s18  ;;  %p152_p4 = scmp.eq.s32.totalorder %s554_s23, 1 }
   0x8   : > { %s835_s27 = scalar_select %p133_p1, %s757_s20, %s135_s25  }
   0x9   : > { %p837_p5 = por %p146_p2, %p145_p0  ;;  %p841_p6 = por %p152_p4, %p151_p3 }
   0xa   : > { %p557_p7 = scmp.ge.s32.totalorder %s761_s21, 1  ;;  %p190_p8 = scmp.lt.s32.totalorder %s761_s21, 3 }
   0xc   : > { %p191_p9 = pnand %p557_p7, %p190_p8 }
   0xd   : > { %p218_p10 = scmp.lt.s32.totalorder (!%p191_p9), %s820_s22, 1  ;;  %v763_v0 = vmov (!%p191_p9), 0.0|0.0   ;;  %v264_v1 = vld [vmem:[%s1049_s1] sm:$0xff] (!%p191_p9)  ;;  %v265_v2 = vld [vmem:[%s1049_s1 + $0x8] sm:$0xff] (!%p191_p9)  ;;  %v266_v3 = vld [vmem:[%s1049_s1 + $0x10] sm:$0xff] (!%p191_p9)  ;;  %vm238_vm0 = vcmask (!%p191_p9), 516096  }
   0xe   : > { %194 = sbr.rel (%p191_p9) target bundleno = 605 (0x25d), region = 40  ;;  %603 = vmatprep.subr.bf16.mxu0 (!%p191_p9), %v763_v0  ;;  %v604_v4 = vpack.c.bf16 (!%p191_p9), %v265_v2, %v264_v1  ;;  %v267_v5 = vld [vmem:[%s1049_s1 + $0x18] sm:$0xff] (!%p191_p9)  ;;  %v764_v6 = vmov (!%p191_p9), 0.0   ;;  %v268_v8 = vld [vmem:[%s1049_s1 + $0x20] sm:$0xff] (!%p191_p9)  ;;  %v269_v9 = vld [vmem:[%s1049_s1 + $0x28] sm:$0xff] (!%p191_p9)  ;;  %vm248_vm1 = vcmask (!%p191_p9), 523264  }
   0xf   : > { %259 = vst.msk [vmem:[#allocation2 + $0x1f] sm:$0x1] (!%p191_p9), %vm238_vm0, %v764_v6  ;;  %v607_v7 = vpack.c.bf16 (!%p191_p9), %v267_v5, %v266_v3  ;;  %vm250_vm2 = vcmask (!%p191_p9), 1046528   ;;  %vm257_vm3 = vcmask (!%p191_p9), 522240   ;;  %v610_v14 = vpack.c.bf16 (!%p191_p9), %v269_v9, %v268_v8  ;;  %s765_s6 = smov (!%p191_p9), 64   ;;  %v270_v18 = vld [vmem:[%s1049_s1 + $0x30] sm:$0xff] (!%p191_p9) }
  0x10   : > { %605 = vmatpush1.bf16.msra.mxu0 (!%p191_p9), %v604_v4  ;;  %vm240_vm4 = vcmask (!%p191_p9), 1040384   ;;  %v271_v19 = vld [vmem:[%s1049_s1 + $0x38] sm:$0xff] (!%p191_p9)  ;;  %v378_v20 = vld [vmem:[%s1051_s3] sm:$0xff] (!%p191_p9)  ;;  %v379_v22 = vld [vmem:[%s1051_s3 + $0x8] sm:$0xff] (!%p191_p9)  ;;  %vm235_vm5 = vcmask (!%p191_p9), 1048064   ;;  %vm246_vm6 = vcmask (!%p191_p9), 523265  }
  0x11   : > { %606 = vmatprep.subr.bf16.mxu0 (!%p191_p9), %v763_v0  ;;  %v380_v23 = vld [vmem:[%s1051_s3 + $0x10] sm:$0xff] (!%p191_p9)  ;;  %v381_v24 = vld [vmem:[%s1051_s3 + $0x18] sm:$0xff] (!%p191_p9)  ;;  %v639_v26 = vpack.c.bf16 (!%p191_p9), %v379_v22, %v378_v20  ;;  %v613_v27 = vpack.c.bf16 (!%p191_p9), %v271_v19, %v270_v18  ;;  %v272_v30 = vld [vmem:[%s1049_s1 + $0x40] sm:$0xff] (!%p191_p9)  ;;  %s215_s13 = sand.u32 (!%p191_p9), 1, %s753_s19   ;;  %s573_s25 = sshll.u32 (!%p191_p9), %s820_s22, 8 }
  0x12   : > { %v643_v29 = vpack.c.bf16 (!%p191_p9), %v381_v24, %v380_v23  ;;  %v273_v31 = vld [vmem:[%s1049_s1 + $0x48] sm:$0xff] (!%p191_p9)  ;;  %v274_v33 = vld [vmem:[%s1049_s1 + $0x50] sm:$0xff] (!%p191_p9)  ;;  %v275_v34 = vld [vmem:[%s1049_s1 + $0x58] sm:$0xff] (!%p191_p9)  ;;  %s1000_s7 = scalar_lea.hbm (!%p191_p9), %s1053_s5, %s573_s25  ;;  %s766_s9 = smov (!%p191_p9), [#allocation3]  }
  0x13   : > { %640 = vmatprep.subr.bf16.mxu1 (!%p191_p9), %v639_v26  ;;  %v616_v32 = vpack.c.bf16 (!%p191_p9), %v273_v31, %v272_v30  ;;  %v619_v36 = vpack.c.bf16 (!%p191_p9), %v275_v34, %v274_v33  ;;  %v276_v37 = vld [vmem:[%s1049_s1 + $0x60] sm:$0xff] (!%p191_p9)  ;;  %v277_v38 = vld [vmem:[%s1049_s1 + $0x68] sm:$0xff] (!%p191_p9)  ;;  %v278_v40 = vld [vmem:[%s1049_s1 + $0x70] sm:$0xff] (!%p191_p9) }
  0x14   : > { %608 = vmatpush1.bf16.msra.mxu0 (!%p191_p9), %v607_v7  ;;  %642 = vmatpush3.bf16.msra.mxu1 (!%p191_p9), %v639_v26  ;;  %v622_v39 = vpack.c.bf16 (!%p191_p9), %v277_v38, %v276_v37  ;;  %v279_v41 = vld [vmem:[%s1049_s1 + $0x78] sm:$0xff] (!%p191_p9)  ;;  %v280_v43 = vld [vmem:[%s1049_s1 + $0x80] sm:$0xff] (!%p191_p9)  ;;  %v281_v44 = vld [vmem:[%s1049_s1 + $0x88] sm:$0xff] (!%p191_p9) }
  0x15   : > { %s219_s11 = scalar_select %p218_p10, %s820_s22, 1  ;;  %609 = vmatprep.subr.bf16.mxu0 %v763_v0  ;;  %644 = vmatprep.subr.bf16.mxu1 %v643_v29  ;;  %v625_v42 = vpack.c.bf16 %v279_v41, %v278_v40  ;;  %v628_v45 = vpack.c.bf16 %v281_v44, %v280_v43  ;;  %v282_v46 = vld [vmem:[%s1049_s1 + $0x90] sm:$0xff]  ;;  %v283_v47 = vld [vmem:[%s1049_s1 + $0x98] sm:$0xff]  ;;  %v284_v49 = vld [vmem:[%s1049_s1 + $0xa0] sm:$0xff] }
  0x16   : > { %v631_v48 = vpack.c.bf16 %v283_v47, %v282_v46  ;;  %v285_v50 = vld [vmem:[%s1049_s1 + $0xa8] sm:$0xff]  ;;  %v286_v52 = vld [vmem:[%s1049_s1 + $0xb0] sm:$0xff]  ;;  %v287_v53 = vld [vmem:[%s1049_s1 + $0xb8] sm:$0xff]  ;;  %s1007_s22 = scalar_lea.sflag [#allocation4], %s215_s13 }
  0x17   : > { %s572_s14 = sshll.u32 %s219_s11, 4  ;;  %v634_v51 = vpack.c.bf16 %v285_v50, %v284_v49  ;;  %v637_v54 = vpack.c.bf16 %v287_v53, %v286_v52  ;;  %v382_v60 = vld [vmem:[%s1051_s3 + $0x20] sm:$0xff]  ;;  %v383_v61 = vld [vmem:[%s1051_s3 + $0x28] sm:$0xff]  ;;  %v384_v63 = vld [vmem:[%s1051_s3 + $0x30] sm:$0xff] }
  0x18   : > { %s222_s17 = scalar_lea.vmem %s1048_s0, %s572_s14  ;;  %611 = vmatpush1.bf16.msra.mxu0 %v610_v14  ;;  %646 = vmatpush3.bf16.msra.mxu1 %v643_v29  ;;  %v647_v62 = vpack.c.bf16 %v383_v61, %v382_v60  ;;  %v561_v2 = vld [vmem:[%s1050_s2] ss:$0 sm:$0xff]  ;;  %s558_s14 = sshll.u32 %s215_s13, 4 }
  0x19   : > { %v874_v10 = vld [vmem:[%s222_s17] sm:$0xff]  ;;  %v876_v11 = vld [vmem:[%s222_s17 + $0x8] sm:$0xff]  ;;  %612 = vmatprep.subr.bf16.mxu0 %v763_v0  ;;  %s217_s17 = scalar_lea.vmem [#allocation3], %s558_s14 }
  0x1a   : > { %v879_v12 = vmax.f32 %v874_v10, 0.0  ;;  %v226_v13 = vmax.f32 %v876_v11, 0.0  ;;  %648 = vmatprep.subr.bf16.mxu1 %v647_v62  ;;  %s492_s23 = sshll.u32 %s217_s17, 4  ;;  %s1002_s23 = int_to_ptr.vmem [resolvable:$true] %s492_s23 }
  0x1b   : > { %s699_s8 = scalar_lea.vmem %s1002_s23, 256 }
  0x1c   : > { %229 = vrot.lane.b32.xlu0 %v879_v12, %s765_s6  ;;  %v251_v15 = vrot.slane %v879_v12, 1  ;;  %v242_v16 = vrot.slane %v226_v13, 7  ;;  %v252_v17 = vrot.slane %v226_v13, 1  ;;  %v241_v21 = vrot.slane %v879_v12, 7  ;;  %614 = vmatpush1.bf16.msra.mxu0 %v613_v27  ;;  %p700_p11 = scmp.ne.s32.totalorder %s1002_s23, %s699_s8 }
  0x1d   : > { %615 = vmatprep.subr.bf16.mxu0 %v763_v0  ;;  %650 = vmatpush3.bf16.msra.mxu1 %v647_v62 }
  0x1e   : > { %258 = vst.msk [vmem:[#allocation2 + $0x18] sm:$0x7f] %vm257_vm3, %v252_v17  ;;  %v253_v25 = vsel %vm250_vm2, %v251_v15, %v252_v17  ;;  %v243_v28 = vsel %vm240_vm4, %v241_v21, %v242_v16  ;;  %p701_p12 = pnand %p700_p11, %p837_p5 }
  0x1f   : > { %256 = vst.msk [vmem:[#allocation2 + $0x8] sm:$0xff] %vm248_vm1, %v253_v25 }
  0x20   : > { %231 = vrot.lane.b32.xlu0 %v226_v13, %s765_s6  ;;  %617 = vmatpush1.bf16.msra.mxu0 %v616_v32  ;;  %v564_v13 = vld [vmem:[%s1052_s4] ss:$0 sm:$0xff]  ;;  %p702_p13 = pneg %p701_p12  ;;  %s703_s6 = sshll.u32 %s766_s9, 4  ;;  %s704_s6 = int_to_ptr.vmem [resolvable:$false] %s703_s6 }
  0x21   : > { %618 = vmatprep.subr.bf16.mxu0 %v763_v0  ;;  %s705_s10 = scalar_lea.vmem %s704_s6, 512  ;;  %p706_p0 = scmp.lt.s32.totalorder %s1002_s23, %s704_s6 }
  0x22   : > { %p707_p1 = scmp.lt.s32.totalorder %s705_s10, %s699_s8 }
  0x24   : > { %620 = vmatpush1.bf16.msra.mxu0 %v619_v36  ;;  %p708_p2 = por %p707_p1, %p706_p0 }
  0x25   : > { %621 = vmatprep.subr.bf16.mxu0 %v763_v0  ;;  %v263_v57 = vld [vmem:[#allocation2 + $0x18] sm:$0xff] }
  0x26   : > { %v261_v35 = vld [vmem:[#allocation2 + $0x8] sm:$0xff]  ;;  %p709_p3 = pnand %p708_p2, %p702_p13 }
  0x27   : > { %562 = vmatprep.mubr.msk.f32.mxu0 %vm248_vm1, %v261_v35 }
  0x28   : > { %623 = vmatpush1.bf16.msra.mxu0 %v622_v39 }
  0x29   : > { %624 = vmatprep.subr.bf16.mxu0 %v763_v0 }
  0x2c   : > { %626 = vmatpush1.bf16.msra.mxu0 %v625_v42 }
  0x2d   : > { %627 = vmatprep.subr.bf16.mxu0 %v763_v0 }
  0x30   : > { %629 = vmatpush1.bf16.msra.mxu0 %v628_v45 }
  0x31   : > { %630 = vmatprep.subr.bf16.mxu0 %v763_v0 }
  0x34   : > { %632 = vmatpush1.bf16.msra.mxu0 %v631_v48 }
  0x35   : > { %633 = vmatprep.subr.bf16.mxu0 %v763_v0 }
  0x38   : > { %635 = vmatpush1.bf16.msra.mxu0 %v634_v51 }
  0x39   : > { %636 = vmatprep.subr.bf16.mxu0 %v763_v0  ;;  %v385_v0 = vld [vmem:[%s1051_s3 + $0x38] sm:$0xff] }
  0x3a   : > { %v651_v1 = vpack.c.bf16 %v385_v0, %v384_v63 }
  0x3c   : > { %638 = vmatpush1.bf16.msra.mxu0 %v637_v54  ;;  %652 = vmatprep.subr.bf16.mxu1 %v651_v1 }
  0x3d   : > { %654 = vmatpush3.bf16.msra.mxu1 %v651_v1 }
  0x8e   : > { %v230_v55 = vpop.permute.xlu0 %229 }
  0x8f   : > { %236 = vst.msk [vmem:[#allocation2] sm:$0xff] %vm235_vm5, %v230_v55 }
  0x90   : > { %239 = vst.msk [vmem:[#allocation2] sm:$0x1] %vm238_vm0, %v764_v6 }
  0x91   : > { %247 = vst.msk [vmem:[#allocation2] sm:$0xfe] %vm246_vm6, %v241_v21 }
  0x92   : > { %v232_v56 = vpop.permute.xlu0 %231 }
  0x93   : > { %237 = vst.msk [vmem:[#allocation2 + $0x10] sm:$0xff] %vm235_vm5, %v232_v56 }
  0x94   : > { %249 = vst.msk [vmem:[#allocation2 + $0x10] sm:$0xff] %vm248_vm1, %v243_v28 }
  0x98   : > { %v260_v58 = vld [vmem:[#allocation2] sm:$0xff] }
  0x99   : > { %366 = vmatmul.mubr.f32.vlgmr.msra.gmra.mrb[0].mxu0 %v260_v58 }
  0x9a   : > { %563 = vmatprep.mubr.msk.f32.mxu0 %vm248_vm1, %v263_v57 }
  0x9b   : > { %v262_v59 = vld [vmem:[#allocation2 + $0x10] sm:$0xff] }
  0x9d   : > { %371 = vmatmul.mubr.f32.gmra.mrb[2].mxu0 %v262_v59 }
 0x16c   : > { %v367_v3 = vpop.f32.mrb[0].mxu0 }
 0x16d   : > { %v368_v4 = vadd.f32 %v561_v2, %v367_v3  ;;  %v369_v5 = vpop.f32.mrb[1].mxu0 }
 0x16f   : > { %v376_v6 = vmax.f32 %v368_v4, 0.0 }
 0x170   : > { %v372_v7 = vpop.f32.mrb[2].mxu0 }
 0x171   : > { %v373_v8 = vadd.f32 %v561_v2, %v372_v7  ;;  %v374_v9 = vpop.f32.mrb[3].mxu0  ;;  %600 = vmatprep.mubr.msk.f32.mxu1 %vm248_vm1, %v376_v6 }
 0x173   : > { %v377_v12 = vmax.f32 %v373_v8, 0.0 }
 0x175   : > { %601 = vmatmul.mubr.msk.f32.vlgmr.msra.gmra.mrb[0].mxu1 %vm248_vm1, %v377_v12 }
 0x248   : > { %v602_v14 = vpop.f32.mrb[0].mxu1 }
 0x249   : > { %v471_v15 = vadd.f32 %v602_v14, %v564_v13  ;;  %v465_v16 = vpop.f32.mrb[1].mxu1 }
 0x24a   : > { %v466_v17 = vadd.f32 %v564_v13, %v465_v16 }
 0x24b   : > { %v475_v18 = vadd.f32 %v471_v15, %v876_v11 }
 0x24c   : > { %v474_v19 = vadd.f32 %v466_v17, %v874_v10 }
 0x24d   : > { %477 = vst.msk [vmem:[%s217_s17 + $0x8] sm:$0xff] %vm248_vm1, %v475_v18 }
 0x24e   : > { %476 = vst.msk [vmem:[%s217_s17] sm:$0xff] %vm248_vm1, %v474_v19 }
 0x24f   : > { %712 = shalt.err (!%p709_p3)
}
 0x250   : > { %s713_s11 = scalar_lea.hbm %s1000_s7, 256  ;;  %s717_s14 = scalar_lea.hbm %s1053_s5, 512 }
 0x251   : > { %p714_p4 = scmp.ne.s32.totalorder %s1000_s7, %s713_s11  ;;  %p718_p9 = scmp.lt.u32.totalorder %s1000_s7, %s1053_s5 }
 0x252   : > { %p719_p10 = scmp.lt.u32.totalorder %s717_s14, %s713_s11  ;;  %p721_p12 = scmp.lt.u32.totalorder %s713_s11, %s1000_s7 }
 0x253   : > { %p715_p7 = pnand %p714_p4, %p837_p5 }
 0x254   : > { %p720_p11 = por %p719_p10, %p718_p9 }
 0x255   : > { %p716_p8 = pneg %p715_p7 }
 0x256   : > { %p722_p13 = por %p721_p12, %p720_p11 }
 0x258   : > { %p723_p0 = pnand %p722_p13, %p716_p8 }
 0x25a   : > { %726 = shalt.err (!%p723_p0)
}
 0x25b   : > { %s767_s17 = smov 128   ;;  %s768_s25 = smov 8  }
 0x25c   : > { %655 = dma.vmem_to_hbm [thread:$0]  (%p837_p5), %s1002_s23, 256, %s1000_s7, %s1007_s22, %s767_s17, %s767_s17, %s768_s25  }
 0x25d PF: > { %p661_p1 = scmp.ge.s32.totalorder %s761_s21, 2  ;;  %s507_s26 = sand.u32 1, %s749_s18  }
 0x25e   : > { %s508_s30 = scalar_lea.sflag [#allocation4], %s507_s26 }
 0x25f   : > { %p658_p2 = pnand %p661_p1, %p841_p6 }
 0x261   : > { %744 = dma.done.wait (!%p658_p2), %s508_s30, 256  }
 0x262   : > { %746 = vsyncadd (!%p658_p2), %s508_s30, 4294967040  ;;  %p15_p3 = scmp.ge.s32.totalorder %s824_s24, 4   ;;  %s1056_s18 = smov %s753_s19 }
 0x263   : > { %s1057_s19 = smov %s757_s20  ;;  %s1058_s20 = smov %s835_s27 }
 0x264   : > { %s1059_s21 = smov %s824_s24  ;;  %17 = sbr.rel (!%p15_p3) target bundleno = 3 (0x3), region = 75 }
 0x26b   :  { %513 = vsyncpa [#allocation4], 1 }
 0x26c   :  { %515 = vsyncpa [#allocation4 + $0x1], 1 }

</bundles_post_ra>
